<compile_context>
chip_gen: v7x
topology: tpu7x:2x2x1
jax: 0.10.0
libtpu: 0.0.40
codegen_flags: <defaults>
</compile_context>

<pallas_src>
import functools

import jax
import jax.numpy as jnp
from jax.experimental import pallas as pl
from jax.experimental.pallas import tpu as pltpu

LANE = 128  # lane width: padded hidden size and padded action count


def _round_up(n, m):
    return (n + m - 1) // m * m


def qnet_kernel(x_ref, p_ref, o_ref, *, obs_dim,
                off_w1, off_b1, off_w2, off_b2, off_w3, off_b3):
    # Static slices into the VMEM-resident packed parameter slab (all offsets are
    # Python ints; segment starts are multiples of 8, so slices are sublane-aligned).
    w1 = p_ref[off_w1:off_w1 + obs_dim, :]      # (obs_dim, 128)
    b1 = p_ref[off_b1:off_b1 + 1, :]            # (1, 128)
    w2 = p_ref[off_w2:off_w2 + LANE, :]         # (128, 128)
    b2 = p_ref[off_b2:off_b2 + 1, :]
    w3 = p_ref[off_w3:off_w3 + LANE, :]         # (128, 128)
    b3 = p_ref[off_b3:off_b3 + 1, :]

    x = x_ref[...]                              # (tb, obs_dim) streamed batch tile
    h1 = jnp.tanh(jnp.dot(x, w1, preferred_element_type=jnp.float32) + b1)
    h2 = jnp.tanh(jnp.dot(h1, w2, preferred_element_type=jnp.float32) + b2)
    out = jnp.dot(h2, w3, preferred_element_type=jnp.float32) + b3
    o_ref[...] = out.astype(o_ref.dtype)        # lane-dense (tb, 128) store


@functools.partial(jax.jit, static_argnames=("block_b",))
def qnetwork_forward(x, w1, b1, w2, b2, w3, b3, block_b=512):
    B, obs_dim = x.shape
    hidden = w1.shape[1]
    n_actions = w3.shape[1]
    assert hidden <= LANE and n_actions <= LANE

    def pad2(a, rows, cols):
        return jnp.pad(a, ((0, rows - a.shape[0]), (0, cols - a.shape[1])))

    # ---- pack all params into one lane-dense, sublane-aligned (R, 128) slab ----
    r1 = _round_up(obs_dim + 1, 8)      # W1 rows + b1 row, padded to sublane multiple
    r23 = _round_up(LANE + 1, 8)        # W2/W3 (128 rows) + bias row -> 136
    seg1 = pad2(jnp.concatenate([pad2(w1, obs_dim, LANE),
                                 pad2(b1.reshape(1, -1), 1, LANE)], axis=0), r1, LANE)
    seg2 = pad2(jnp.concatenate([pad2(w2, LANE, LANE),
                                 pad2(b2.reshape(1, -1), 1, LANE)], axis=0), r23, LANE)
    seg3 = pad2(jnp.concatenate([pad2(w3, LANE, LANE),
                                 pad2(b3.reshape(1, -1), 1, LANE)], axis=0), r23, LANE)
    params = jnp.concatenate([seg1, seg2, seg3], axis=0).astype(jnp.float32)
    R = r1 + 2 * r23

    # ---- batch tiling: tile rows are a multiple of 8, last tile padded ----
    tb = min(_round_up(block_b, 8), _round_up(B, 8))
    b_pad = _round_up(B, tb)
    x_p = jnp.pad(x.astype(jnp.float32), ((0, b_pad - B), (0, 0)))

    kernel = functools.partial(
        qnet_kernel, obs_dim=obs_dim,
        off_w1=0, off_b1=obs_dim,
        off_w2=r1, off_b2=r1 + LANE,
        off_w3=r1 + r23, off_b3=r1 + r23 + LANE,
    )
    out_p = pl.pallas_call(
        kernel,
        out_shape=jax.ShapeDtypeStruct((b_pad, LANE), jnp.float32),
        grid=(b_pad // tb,),
        in_specs=[
            pl.BlockSpec((tb, obs_dim), lambda i: (i, 0)),   # streamed x tile
            pl.BlockSpec((R, LANE), lambda i: (0, 0)),       # resident packed params
        ],
        out_specs=pl.BlockSpec((tb, LANE), lambda i: (i, 0)),
        compiler_params=pltpu.CompilerParams(
            dimension_semantics=("parallel",)),
    )(x_p, params)
    return out_p[:B, :n_actions]


def init_params(key, obs_dim, hidden, n_actions):
    """Deterministic init mimicking PyTorch nn.Linear default: U(-1/sqrt(fan_in), 1/sqrt(fan_in))."""
    ks = jax.random.split(key, 6)

    def linear(kw, kb, fan_in, fan_out):
        bound = 1.0 / jnp.sqrt(jnp.float32(fan_in))
        w = jax.random.uniform(kw, (fan_in, fan_out), jnp.float32, -bound, bound)
        b = jax.random.uniform(kb, (1, fan_out), jnp.float32, -bound, bound)
        return w, b

    w1, b1 = linear(ks[0], ks[1], obs_dim, hidden)
    w2, b2 = linear(ks[2], ks[3], hidden, hidden)
    w3, b3 = linear(ks[4], ks[5], hidden, n_actions)
    return w1, b1, w2, b2, w3, b3


if __name__ == "__main__":
    # Small env-like shapes: observation_space.shape = (8,), action_space.n = 4, batch = 2.
    batch, obs_dim, hidden, n_actions = 2, 8, 64, 4

    key = jax.random.PRNGKey(0)
    k_x, k_p, k_x2 = jax.random.split(key, 3)
    x = jax.random.normal(k_x, (batch, obs_dim), jnp.float32)
    params = init_params(k_p, obs_dim, hidden, n_actions)

    out = qnetwork_forward(x, *params, block_b=512)
    jax.block_until_ready(out)

    # Reference check in plain JAX (same math as the PyTorch forward).
    w1, b1, w2, b2, w3, b3 = params

    def ref_fwd(xx):
        h = jnp.tanh(xx @ w1 + b1)
        h = jnp.tanh(h @ w2 + b2)
        return h @ w3 + b3

    assert out.shape == (batch, n_actions)
    assert jnp.allclose(out, ref_fwd(x), atol=1e-4, rtol=1e-4)

    # Exercise the multi-tile grid + ragged last tile path.
    x_big = jax.random.normal(k_x2, (300, obs_dim), jnp.float32)
    out_big = qnetwork_forward(x_big, *params, block_b=128)
    jax.block_until_ready(out_big)
    assert out_big.shape == (300, n_actions)
    assert jnp.allclose(out_big, ref_fwd(x_big), atol=1e-4, rtol=1e-4)

    print("KERNEL_OK")
</pallas_src>

<mosaic_0001>
module attributes {stable_mosaic.version = 11 : i64} {
  func.func @qnet_kernel(%arg0: i32, %arg1: memref<8x8xf32, #tpu.memory_space<vmem>>, %arg2: memref<288x128xf32, #tpu.memory_space<vmem>>, %arg3: memref<8x128xf32, #tpu.memory_space<vmem>>) attributes {dimension_semantics = [#tpu.dimension_semantics<parallel>], iteration_bounds = array<i64: 1>, scalar_prefetch = 0 : i64, scratch_operands = 0 : i64, tpu.core_type = #tpu.core_type<tc>, window_params = [{transform_indices = @transform_0, window_bounds = array<i64: 8, 8>}, {pipeline_mode = #tpu.pipeline_mode<synchronous>, transform_indices = @transform_1, window_bounds = array<i64: 288, 128>}, {transform_indices = @transform_2, window_bounds = array<i64: 8, 128>}]} {
    %c0 = arith.constant 0 : index
    %c0_0 = arith.constant 0 : index
    %0 = vector.load %arg2[%c0, %c0_0] : memref<288x128xf32, #tpu.memory_space<vmem>>, vector<8x128xf32>
    %c8 = arith.constant 8 : index
    %c0_1 = arith.constant 0 : index
    %1 = vector.load %arg2[%c8, %c0_1] : memref<288x128xf32, #tpu.memory_space<vmem>>, vector<1x128xf32>
    %c16 = arith.constant 16 : index
    %c0_2 = arith.constant 0 : index
    %2 = vector.load %arg2[%c16, %c0_2] : memref<288x128xf32, #tpu.memory_space<vmem>>, vector<128x128xf32>
    %c144 = arith.constant 144 : index
    %c0_3 = arith.constant 0 : index
    %3 = vector.load %arg2[%c144, %c0_3] : memref<288x128xf32, #tpu.memory_space<vmem>>, vector<1x128xf32>
    %c152 = arith.constant 152 : index
    %c0_4 = arith.constant 0 : index
    %4 = vector.load %arg2[%c152, %c0_4] : memref<288x128xf32, #tpu.memory_space<vmem>>, vector<128x128xf32>
    %c280 = arith.constant 280 : index
    %c0_5 = arith.constant 0 : index
    %5 = vector.load %arg2[%c280, %c0_5] : memref<288x128xf32, #tpu.memory_space<vmem>>, vector<1x128xf32>
    %c0_6 = arith.constant 0 : index
    %c0_7 = arith.constant 0 : index
    %6 = vector.load %arg1[%c0_6, %c0_7] : memref<8x8xf32, #tpu.memory_space<vmem>>, vector<8x8xf32>
    %cst = arith.constant dense<0.000000e+00> : vector<8x128xf32>
    %7 = tpu.matmul %6, %0, %cst {dimension_numbers = #tpu.dot_dimension_numbers<[1], [0], [0], [1], [0, 0, 1, 1], [], []>} : vector<8x8xf32>, vector<8x128xf32>, vector<8x128xf32> -> vector<8x128xf32>
    %8 = vector.broadcast %1 : vector<1x128xf32> to vector<8x128xf32>
    %9 = arith.addf %7, %8 : vector<8x128xf32>
    %10 = math.tanh %9 : vector<8x128xf32>
    %cst_8 = arith.constant dense<0.000000e+00> : vector<8x128xf32>
    %11 = tpu.matmul %10, %2, %cst_8 {dimension_numbers = #tpu.dot_dimension_numbers<[1], [0], [0], [1], [0, 0, 1, 1], [], []>} : vector<8x128xf32>, vector<128x128xf32>, vector<8x128xf32> -> vector<8x128xf32>
    %12 = vector.broadcast %3 : vector<1x128xf32> to vector<8x128xf32>
    %13 = arith.addf %11, %12 : vector<8x128xf32>
    %14 = math.tanh %13 : vector<8x128xf32>
    %cst_9 = arith.constant dense<0.000000e+00> : vector<8x128xf32>
    %15 = tpu.matmul %14, %4, %cst_9 {dimension_numbers = #tpu.dot_dimension_numbers<[1], [0], [0], [1], [0, 0, 1, 1], [], []>} : vector<8x128xf32>, vector<128x128xf32>, vector<8x128xf32> -> vector<8x128xf32>
    %16 = vector.broadcast %5 : vector<1x128xf32> to vector<8x128xf32>
    %17 = arith.addf %15, %16 : vector<8x128xf32>
    %c0_10 = arith.constant 0 : index
    %c0_11 = arith.constant 0 : index
    %18 = vector.load %arg3[%c0_10, %c0_11] : memref<8x128xf32, #tpu.memory_space<vmem>>, vector<8x128xf32>
    tpu.vector_store %arg3[%c0_10, %c0_11], %17 {strides = array<i32>} : memref<8x128xf32, #tpu.memory_space<vmem>>, vector<8x128xf32>,
    return
  }
  func.func @transform_0(%arg0: i32) -> (i32, i32) {
    %c0_i32 = arith.constant 0 : i32
    %c0_i32_0 = arith.constant 0 : i32
    return %arg0, %c0_i32 : i32, i32
  }
  func.func @transform_1(%arg0: i32) -> (i32, i32) {
    %c0_i32 = arith.constant 0 : i32
    %c0_i32_0 = arith.constant 0 : i32
    %c0_i32_1 = arith.constant 0 : i32
    return %c0_i32, %c0_i32_0 : i32, i32
  }
  func.func @transform_2(%arg0: i32) -> (i32, i32) {
    %c0_i32 = arith.constant 0 : i32
    %c0_i32_0 = arith.constant 0 : i32
    return %arg0, %c0_i32 : i32, i32
  }
}

</mosaic_0001>

<bundles_post_ra>
// kernel: qnetwork_forward.1
= control target key start
LH: loop header
LB: loop body
LE: loop exit
PB: predicated region body
PF: predicated region fallthrough
CT: control target
= control target key end

     0   :  { %vm52_vm0 = vcmask 64512   ;;  %v451_v0 = vmov 0.0   ;;  %vm452_vm1 = vmmov 0   ;;  %v453_v4 = vmov 0.0|0.0   ;;  %s599_s1 = inlined_call_operand.vmem [shape: f32[288,128], index: 1, kind: input, shape index: {}]   ;;  %s600_s0 = inlined_call_operand.vmem [shape: f32[8,8], index: 0, kind: input, shape index: {}]   ;;  %s601_s2 = inlined_call_operand.vmem [shape: f32[8,128], index: 2, kind: output, shape index: {}]  }
   0x1   :  { %321 = vmatprep.subr.mxu0 %v451_v0  ;;  %v11_v1 = vld [vmem:[%s599_s1] sm:$0xff]  ;;  %323 = vmatprep.mubr.msk.f32.mxu0 %vm452_vm1, %v451_v0  ;;  %v13_v3 = vld [vmem:[%s599_s1 + $0x10] sm:$0xff]  ;;  %v14_v5 = vld [vmem:[%s599_s1 + $0x18] sm:$0xff] }
   0x2   :  { %v47_v2 = vld [vmem:[%s600_s0] sm:$0xff]  ;;  %322 = vmatpush3.msra.mxu0 %v11_v1  ;;  %396 = vmatprep.subr.bf16.mxu1 %v453_v4  ;;  %v16_v7 = vld [vmem:[%s599_s1 + $0x28] sm:$0xff]  ;;  %v397_v8 = vpack.c.bf16 %v14_v5, %v13_v3  ;;  %v17_v10 = vld [vmem:[%s599_s1 + $0x30] sm:$0xff] }
   0x3   :  { %v15_v6 = vld [vmem:[%s599_s1 + $0x20] sm:$0xff]  ;;  %324 = vmatmul.mubr.msk.f32.vlgmr.msra.gmra.mrb[0].mxu0 %vm52_vm0, %v47_v2  ;;  %358 = vmatprep.mubr.msk.f32.mxu1 %vm452_vm1, %v451_v0  ;;  %v18_v11 = vld [vmem:[%s599_s1 + $0x38] sm:$0xff]  ;;  %v20_v14 = vld [vmem:[%s599_s1 + $0x48] sm:$0xff] }
   0x4   :  { %420 = vmatprep.subr.bf16.mxu0 %v453_v4  ;;  %393 = vmatprep.mubr.msk.f32.mxu0 %vm452_vm1, %v451_v0  ;;  %v400_v9 = vpack.c.bf16 %v16_v7, %v15_v6  ;;  %v403_v12 = vpack.c.bf16 %v18_v11, %v17_v10  ;;  %v19_v13 = vld [vmem:[%s599_s1 + $0x40] sm:$0xff]  ;;  %v21_v16 = vld [vmem:[%s599_s1 + $0x50] sm:$0xff]  ;;  %v22_v17 = vld [vmem:[%s599_s1 + $0x58] sm:$0xff] }
   0x5   :  { %398 = vmatpush3.bf16.msra.mxu1 %v397_v8  ;;  %v406_v15 = vpack.c.bf16 %v20_v14, %v19_v13  ;;  %v409_v18 = vpack.c.bf16 %v22_v17, %v21_v16  ;;  %v23_v19 = vld [vmem:[%s599_s1 + $0x60] sm:$0xff]  ;;  %v24_v20 = vld [vmem:[%s599_s1 + $0x68] sm:$0xff]  ;;  %v25_v22 = vld [vmem:[%s599_s1 + $0x70] sm:$0xff] }
   0x6   :  { %399 = vmatprep.subr.bf16.mxu1 %v453_v4  ;;  %v412_v21 = vpack.c.bf16 %v24_v20, %v23_v19  ;;  %v26_v23 = vld [vmem:[%s599_s1 + $0x78] sm:$0xff]  ;;  %v27_v25 = vld [vmem:[%s599_s1 + $0x80] sm:$0xff]  ;;  %v28_v26 = vld [vmem:[%s599_s1 + $0x88] sm:$0xff] }
   0x7   :  { %v415_v24 = vpack.c.bf16 %v26_v23, %v25_v22  ;;  %v418_v27 = vpack.c.bf16 %v28_v26, %v27_v25  ;;  %v30_v28 = vld [vmem:[%s599_s1 + $0x98] sm:$0xff]  ;;  %v31_v29 = vld [vmem:[%s599_s1 + $0xa0] sm:$0xff]  ;;  %v32_v30 = vld [vmem:[%s599_s1 + $0xa8] sm:$0xff] }
   0x8   :  { %v421_v31 = vpack.c.bf16 %v31_v29, %v30_v28  ;;  %v33_v32 = vld [vmem:[%s599_s1 + $0xb0] sm:$0xff]  ;;  %v34_v34 = vld [vmem:[%s599_s1 + $0xb8] sm:$0xff]  ;;  %v35_v35 = vld [vmem:[%s599_s1 + $0xc0] sm:$0xff] }
   0x9   :  { %401 = vmatpush3.bf16.msra.mxu1 %v400_v9  ;;  %v424_v33 = vpack.c.bf16 %v33_v32, %v32_v30  ;;  %v427_v36 = vpack.c.bf16 %v35_v35, %v34_v34  ;;  %v36_v37 = vld [vmem:[%s599_s1 + $0xc8] sm:$0xff]  ;;  %v37_v38 = vld [vmem:[%s599_s1 + $0xd0] sm:$0xff]  ;;  %v38_v40 = vld [vmem:[%s599_s1 + $0xd8] sm:$0xff] }
   0xa   :  { %402 = vmatprep.subr.bf16.mxu1 %v453_v4  ;;  %422 = vmatpush3.bf16.msra.mxu0 %v421_v31  ;;  %v430_v39 = vpack.c.bf16 %v37_v38, %v36_v37  ;;  %v39_v41 = vld [vmem:[%s599_s1 + $0xe0] sm:$0xff]  ;;  %v281_v43 = vld [vmem:[%s599_s1 + $0x8] ss:$0 sm:$0xff]  ;;  %v41_v49 = vld [vmem:[%s599_s1 + $0xf0] sm:$0xff] }
   0xb   :  { %423 = vmatprep.subr.bf16.mxu0 %v453_v4  ;;  %v433_v42 = vpack.c.bf16 %v39_v41, %v38_v40  ;;  %v40_v48 = vld [vmem:[%s599_s1 + $0xe8] sm:$0xff]  ;;  %v42_v51 = vld [vmem:[%s599_s1 + $0xf8] sm:$0xff]  ;;  %v43_v52 = vld [vmem:[%s599_s1 + $0x100] sm:$0xff] }
   0xc   :  { %v436_v50 = vpack.c.bf16 %v41_v49, %v40_v48  ;;  %v439_v53 = vpack.c.bf16 %v43_v52, %v42_v51  ;;  %v44_v54 = vld [vmem:[%s599_s1 + $0x108] sm:$0xff]  ;;  %v45_v55 = vld [vmem:[%s599_s1 + $0x110] sm:$0xff]  ;;  %v284_v62 = vld [vmem:[%s599_s1 + $0x118] ss:$0 sm:$0xff] }
   0xd   :  { %404 = vmatpush3.bf16.msra.mxu1 %v403_v12  ;;  %v442_v56 = vpack.c.bf16 %v45_v55, %v44_v54  ;;  %v283_v57 = vld [vmem:[%s599_s1 + $0x90] ss:$0 sm:$0xff] }
   0xe   :  { %405 = vmatprep.subr.bf16.mxu1 %v453_v4  ;;  %425 = vmatpush3.bf16.msra.mxu0 %v424_v33 }
   0xf   :  { %426 = vmatprep.subr.bf16.mxu0 %v453_v4 }
  0x11   :  { %407 = vmatpush3.bf16.msra.mxu1 %v406_v15 }
  0x12   :  { %408 = vmatprep.subr.bf16.mxu1 %v453_v4  ;;  %428 = vmatpush3.bf16.msra.mxu0 %v427_v36 }
  0x13   :  { %429 = vmatprep.subr.bf16.mxu0 %v453_v4 }
  0x15   :  { %410 = vmatpush3.bf16.msra.mxu1 %v409_v18 }
  0x16   :  { %411 = vmatprep.subr.bf16.mxu1 %v453_v4  ;;  %431 = vmatpush3.bf16.msra.mxu0 %v430_v39 }
  0x17   :  { %432 = vmatprep.subr.bf16.mxu0 %v453_v4 }
  0x19   :  { %413 = vmatpush3.bf16.msra.mxu1 %v412_v21 }
  0x1a   :  { %414 = vmatprep.subr.bf16.mxu1 %v453_v4  ;;  %434 = vmatpush3.bf16.msra.mxu0 %v433_v42 }
  0x1b   :  { %435 = vmatprep.subr.bf16.mxu0 %v453_v4 }
  0x1d   :  { %416 = vmatpush3.bf16.msra.mxu1 %v415_v24 }
  0x1e   :  { %417 = vmatprep.subr.bf16.mxu1 %v453_v4  ;;  %437 = vmatpush3.bf16.msra.mxu0 %v436_v50 }
  0x1f   :  { %438 = vmatprep.subr.bf16.mxu0 %v453_v4 }
  0x21   :  { %419 = vmatpush3.bf16.msra.mxu1 %v418_v27 }
  0x22   :  { %440 = vmatpush3.bf16.msra.mxu0 %v439_v53 }
  0x23   :  { %441 = vmatprep.subr.bf16.mxu0 %v453_v4 }
  0x26   :  { %443 = vmatpush3.bf16.msra.mxu0 %v442_v56 }
  0xd6   :  { %v122_v44 = vpop.f32.mrb[0].mxu0 }
  0xd7   :  { %v123_v45 = vadd.f32 %v281_v43, %v122_v44  ;;  %v325_v46 = vpop.f32.mrb[1].mxu0 }
  0xd9   :  { %447 = vtanh.f32 %v123_v45 }
  0xe3   :  { %v448_v47 = vpop.eup %447 }
  0xe4   :  { %359 = vmatmul.mubr.f32.vlgmr.msra.gmra.mrb[0].mxu1 %v448_v47 }
 0x1b7   :  { %v197_v58 = vpop.f32.mrb[0].mxu1 }
 0x1b8   :  { %v198_v59 = vadd.f32 %v283_v57, %v197_v58  ;;  %v360_v60 = vpop.f32.mrb[1].mxu1 }
 0x1ba   :  { %449 = vtanh.f32 %v198_v59 }
 0x1c4   :  { %v450_v61 = vpop.eup %449 }
 0x1c5   :  { %394 = vmatmul.mubr.f32.vlgmr.msra.gmra.mrb[2].mxu0 %v450_v61 }
 0x298   :  { %v272_v63 = vpop.f32.mrb[2].mxu0 }
 0x299   :  { %v273_v0 = vadd.f32 %v284_v62, %v272_v63  ;;  %v395_v1 = vpop.f32.mrb[3].mxu0 }
 0x29b   :  { %276 = vst [vmem:[%s601_s2] sm:$0xff] %v273_v0 }

</bundles_post_ra>
